<compile_context>
chip_gen: v5e
topology: v5e:2x2
jax: 0.10.0
libtpu: 0.0.40
codegen_flags: <defaults>
</compile_context>

<pallas_src>
import jax
import jax.numpy as jnp
from jax.experimental import pallas as pl
from jax.experimental.pallas import tpu as pltpu


def _round_up(x, m):
    return ((x + m - 1) // m) * m


# ---------------------------------------------------------------------------
# Fast path: whole embedding table resident in VMEM, vectorized gather.
# ---------------------------------------------------------------------------
def _vmem_gather_kernel(idx_ref, table_ref, out_ref):
    # idx_ref:   (BLK, 1) int32  -- this step's indices (sublane-dense column)
    # table_ref: (N, D)          -- full table, fetched into VMEM once
    # out_ref:   (BLK, D)        -- sublane/lane-dense output slab
    idx = idx_ref[...]                                        # (BLK, 1)
    blk = idx.shape[0]
    n = table_ref.shape[0]
    # Gather realized as one-hot @ table on the MXU: fully vectorized, no
    # per-row DMAs, no unsupported dynamic-gather lowering.
    cols = jax.lax.broadcasted_iota(jnp.int32, (blk, n), 1)   # (BLK, N)
    onehot = (cols == idx).astype(table_ref.dtype)            # (BLK, N)
    out_ref[...] = jnp.dot(
        onehot, table_ref[...], preferred_element_type=jnp.float32
    ).astype(out_ref.dtype)


def _embedding_lookup_vmem(idx_flat, emb_table, blk):
    n, d = emb_table.shape
    b = idx_flat.shape[0]
    idx2d = idx_flat.reshape(b, 1)
    return pl.pallas_call(
        _vmem_gather_kernel,
        out_shape=jax.ShapeDtypeStruct((b, d), emb_table.dtype),
        grid_spec=pltpu.PrefetchScalarGridSpec(
            num_scalar_prefetch=0,
            grid=(b // blk,),
            in_specs=[
                pl.BlockSpec((blk, 1), lambda i: (i, 0)),   # this step's indices
                pl.BlockSpec((n, d), lambda i: (0, 0)),     # full table (loaded once)
            ],
            out_specs=pl.BlockSpec((blk, d), lambda i: (i, 0)),
        ),
        compiler_params=pltpu.CompilerParams(
            dimension_semantics=("parallel",)),
    )(idx2d, emb_table)


# ---------------------------------------------------------------------------
# Fallback: table too large for VMEM -> data-dependent per-row BlockSpec
# gather (table never resident in VMEM), with a deeper DMA pipeline.
# ---------------------------------------------------------------------------
def _row_gather_kernel(idx_ref, row_ref, out_ref):
    del idx_ref
    out_ref[...] = row_ref[...]


def _embedding_lookup_hbm(idx_flat, emb_table):
    n, d = emb_table.shape
    b = idx_flat.shape[0]
    return pl.pallas_call(
        _row_gather_kernel,
        out_shape=jax.ShapeDtypeStruct((b, d), emb_table.dtype),
        grid_spec=pltpu.PrefetchScalarGridSpec(
            num_scalar_prefetch=1,                          # indices live in SMEM
            grid=(b,),
            in_specs=[
                pl.BlockSpec((1, d), lambda i, idx_ref: (idx_ref[i], 0),
                             pipeline_mode=pl.Buffered(4)),  # keep row fetches in flight
            ],
            out_specs=pl.BlockSpec((1, d), lambda i, idx_ref: (i, 0)),
        ),
        compiler_params=pltpu.CompilerParams(
            dimension_semantics=("parallel",)),
    )(idx_flat, emb_table)


# ---------------------------------------------------------------------------
# Wrapper: GenericEmbeddings.forward(idx) == emb_table[idx]
# ---------------------------------------------------------------------------
def generic_embeddings(idx, emb_table, *, max_block=512,
                       vmem_budget_bytes=12 * 1024 * 1024):
    n, d = emb_table.shape
    idx = jnp.asarray(idx)
    orig_shape = idx.shape

    # Flatten arbitrary index shapes; clamp for bounds safety (matches the
    # pure-JAX reference semantics of emb_table[idx]).
    idx_flat = jnp.clip(idx.astype(jnp.int32).reshape(-1), 0, n - 1)
    b = idx_flat.shape[0]

    itemsize = jnp.dtype(emb_table.dtype).itemsize
    sub = 8 * max(1, 4 // itemsize)            # sublane-dense: 8 f32 / 16 bf16 / 32 i8
    blk = min(max_block, _round_up(b, sub))
    blk = _round_up(blk, sub)
    b_pad = _round_up(b, blk)
    if b_pad != b:
        idx_flat = jnp.concatenate(
            [idx_flat, jnp.zeros((b_pad - b,), jnp.int32)])

    # VMEM footprint of the fast path (double-buffered inputs/outputs + onehot).
    table_bytes = n * d * itemsize
    out_blk_bytes = blk * d * itemsize
    onehot_bytes = blk * n * 4
    fast_bytes = 2 * (table_bytes + out_blk_bytes + blk * 4) + onehot_bytes

    if fast_bytes <= vmem_budget_bytes:
        out = _embedding_lookup_vmem(idx_flat, emb_table, blk)
    else:
        out = _embedding_lookup_hbm(idx_flat, emb_table)

    return out[:b].reshape(orig_shape + (d,))


def reference_forward(idx, emb_table):
    """Pure-JAX reference replicating nn.Embedding.forward."""
    return emb_table[jnp.asarray(idx, dtype=jnp.int32)]


if __name__ == "__main__":
    num_items, embed_dim = 64, 128        # D multiple of 128 -> lane-dense output

    key = jax.random.PRNGKey(0)
    emb_table = jax.random.normal(key, (num_items, embed_dim), dtype=jnp.float32)

    # Deterministic (batch, seq) index tensor, like the PyTorch module would see.
    idx = jnp.array([[3, 0, 7, 12],
                     [1, 63, 5, 9]], dtype=jnp.int32)

    out = generic_embeddings(idx, emb_table)
    out = jax.block_until_ready(out)

    ref = reference_forward(idx, emb_table)
    assert out.shape == (2, 4, embed_dim), out.shape
    assert jnp.allclose(out, ref, rtol=1e-6, atol=1e-6), (
        f"mismatch: max abs err {jnp.max(jnp.abs(out - ref))}")

    print("KERNEL_OK")
</pallas_src>

<mosaic_0001>
module attributes {stable_mosaic.version = 11 : i64} {
  func.func @_vmem_gather_kernel(%arg0: i32, %arg1: memref<8x1xi32, #tpu.memory_space<vmem>>, %arg2: memref<64x128xf32, #tpu.memory_space<vmem>>, %arg3: memref<8x128xf32, #tpu.memory_space<vmem>>) attributes {dimension_semantics = [#tpu.dimension_semantics<parallel>], iteration_bounds = array<i64: 1>, scalar_prefetch = 0 : i64, scratch_operands = 0 : i64, tpu.core_type = #tpu.core_type<tc>, window_params = [{transform_indices = @transform_0, window_bounds = array<i64: 8, 1>}, {pipeline_mode = #tpu.pipeline_mode<synchronous>, transform_indices = @transform_1, window_bounds = array<i64: 64, 128>}, {transform_indices = @transform_2, window_bounds = array<i64: 8, 128>}]} {
    %c0 = arith.constant 0 : index
    %c0_0 = arith.constant 0 : index
    %0 = vector.load %arg1[%c0, %c0_0] : memref<8x1xi32, #tpu.memory_space<vmem>>, vector<8x1xi32>
    %1 = tpu.iota {dimensions = array<i32: 1>} : vector<8x64xi32>
    %2 = vector.broadcast %0 : vector<8x1xi32> to vector<8x64xi32>
    %3 = arith.cmpi eq, %1, %2 : vector<8x64xi32>
    %4 = arith.extui %3 : vector<8x64xi1> to vector<8x64xi32>
    %5 = arith.sitofp %4 : vector<8x64xi32> to vector<8x64xf32>
    %c0_1 = arith.constant 0 : index
    %c0_2 = arith.constant 0 : index
    %6 = vector.load %arg2[%c0_1, %c0_2] : memref<64x128xf32, #tpu.memory_space<vmem>>, vector<64x128xf32>
    %cst = arith.constant dense<0.000000e+00> : vector<8x128xf32>
    %7 = tpu.matmul %5, %6, %cst {dimension_numbers = #tpu.dot_dimension_numbers<[1], [0], [0], [1], [0, 0, 1, 1], [], []>} : vector<8x64xf32>, vector<64x128xf32>, vector<8x128xf32> -> vector<8x128xf32>
    %c0_3 = arith.constant 0 : index
    %c0_4 = arith.constant 0 : index
    %8 = vector.load %arg3[%c0_3, %c0_4] : memref<8x128xf32, #tpu.memory_space<vmem>>, vector<8x128xf32>
    tpu.vector_store %arg3[%c0_3, %c0_4], %7 {strides = array<i32>} : memref<8x128xf32, #tpu.memory_space<vmem>>, vector<8x128xf32>,
    return
  }
  func.func @transform_0(%arg0: i32) -> (i32, i32) {
    %c0_i32 = arith.constant 0 : i32
    %c0_i32_0 = arith.constant 0 : i32
    return %arg0, %c0_i32 : i32, i32
  }
  func.func @transform_1(%arg0: i32) -> (i32, i32) {
    %c0_i32 = arith.constant 0 : i32
    %c0_i32_0 = arith.constant 0 : i32
    %c0_i32_1 = arith.constant 0 : i32
    return %c0_i32, %c0_i32_0 : i32, i32
  }
  func.func @transform_2(%arg0: i32) -> (i32, i32) {
    %c0_i32 = arith.constant 0 : i32
    %c0_i32_0 = arith.constant 0 : i32
    return %arg0, %c0_i32 : i32, i32
  }
}

</mosaic_0001>

<bundles_post_ra>
// kernel: tpu_custom_call.1
= control target key start
LH: loop header
LB: loop body
LE: loop exit
PB: predicated region body
PF: predicated region fallthrough
CT: control target
= control target key end

     0   :  { %7 = vsyncpa [#allocation3], 0  ;;  %s178_s0 = inlined_call_operand.vmem [shape: s32[8,1], index: 0, kind: input, shape index: {}]   ;;  %s179_s1 = inlined_call_operand.hbm [shape: f32[64,128], index: 1, kind: input, shape index: {}]   ;;  %s180_s2 = inlined_call_operand.hbm [shape: f32[8,128], index: 2, kind: output, shape index: {}]  }
   0x1   :  { %8 = vsyncpa [#allocation4], 0  ;;  %s15_s11 = sshll.u32 %s179_s1, 4  ;;  %s148_s12 = smov [#allocation2]   ;;  %s16_s11 = int_to_ptr.hbm [resolvable:$true] %s15_s11 }
   0x2   :  { %s17_s13 = sshll.u32 %s148_s12, 4  ;;  %s149_s14 = smov 128   ;;  %s18_s13 = int_to_ptr.vmem [resolvable:$true] %s17_s13 }
   0x3   :  { %s150_s15 = smov 8  }
   0x4   :  { %23 = dma.hbm_to_vmem [thread:$0]  %s16_s11, 1024, %s18_s13, [#allocation3], %s149_s14, %s149_s14, %s150_s15  }
   0x5   :  { %144 = dma.done.wait [#allocation3], 1024  }
   0x6   :  { %145 = vsyncadd [#allocation3], 4294966272  ;;  %v151_v0 = vmov 0   ;;  %v28_v1 = vld [vmem:[%s178_s0] sm:$0xff]  ;;  %v44_v2 = vld [vmem:[#allocation2 + $0x38] sm:$0xff]  ;;  %v29_v10 = vlaneseq  ;;  %vm45_vm0 = vcmask 523264  }
   0x7   :  { %95 = vset.pattern.permute.xlu0 %v151_v0  ;;  %v43_v3 = vld [vmem:[#allocation2 + $0x30] sm:$0xff]  ;;  %57 = vmatpush.msra.mxu0 %v44_v2  ;;  %v42_v4 = vld [vmem:[#allocation2 + $0x28] sm:$0xff]  ;;  %v41_v5 = vld [vmem:[#allocation2 + $0x20] sm:$0xff]  ;;  %v152_v13 = vmov 0.0   ;;  %s153_s0 = smov [#allocation5]   ;;  %s77_s20 = sshll.u32 %s180_s2, 4  ;;  %s78_s20 = int_to_ptr.hbm [resolvable:$true] %s77_s20 }
   0x8   :  { %32 = vperm.xlu0 %95, %v28_v1   ;;  %v40_v6 = vld [vmem:[#allocation2 + $0x18] sm:$0xff]  ;;  %v39_v7 = vld [vmem:[#allocation2 + $0x10] sm:$0xff]  ;;  %v38_v8 = vld [vmem:[#allocation2 + $0x8] sm:$0xff]  ;;  %v30_v11 = vand.u32 127, %v29_v10  ;;  %s75_s1 = sshll.u32 %s153_s0, 4  ;;  %s76_s1 = int_to_ptr.vmem [resolvable:$true] %s75_s1 }
   0x9   :  { %58 = vmatpush.msra.mxu0 %v43_v3  ;;  %v37_v9 = vld [vmem:[#allocation2] sm:$0xff] }
   0xb   :  { %59 = vmatpush.msra.mxu0 %v42_v4 }
   0xd   :  { %60 = vmatpush.msra.mxu0 %v41_v5 }
   0xf   :  { %61 = vmatpush.msra.mxu0 %v40_v6 }
  0x11   :  { %62 = vmatpush.msra.mxu0 %v39_v7 }
  0x13   :  { %63 = vmatpush.msra.mxu0 %v38_v8 }
  0x15   :  { %64 = vmatpush.msra.mxu0 %v37_v9 }
  0x7a   :  { %v33_v12 = vpop.permute.xlu0 %32 }
  0x7b   :  { %vm34_vm1 = vcmp.eq.s32.totalorder %v30_v11, %v33_v12 }
  0x7c   :  { %v87_v14 = vsel %vm34_vm1, 1.0, %v152_v13 }
  0x7d   :  { %88 = vmatmul.msk.f32.vlgmr.msra.gmra.mxu0 %vm45_vm0, %v87_v14 }
  0xfa   :  { %v66_v15 = vpop.f32.mrf.mxu0 }
  0xfb   :  { %69 = vst [vmem:[#allocation5] sm:$0xff] %v66_v15 }
  0xfc   :  { %80 = dma.vmem_to_hbm [thread:$0]  %s76_s1, 128, %s78_s20, [#allocation4]  }
  0xfd   :  { %146 = dma.done.wait [#allocation4], 128  }
  0xfe   :  { %147 = vsyncadd [#allocation4], 4294967168 }
  0xff   :  { %85 = vsyncpa [#allocation3], 1 }
 0x100   :  { %86 = vsyncpa [#allocation4], 1 }

</bundles_post_ra>
